<compile_context>
chip_gen: v7x
topology: tpu7x:2x2x1
jax: 0.10.0
libtpu: 0.0.40
codegen_flags: <defaults>
</compile_context>

<pallas_src>
import jax
import jax.numpy as jnp
from jax import lax
from jax.experimental import pallas as pl
from jax.experimental.pallas import tpu as pltpu


_SQRT_2_OVER_PI = 0.7978845608028654


def _gelu_tanh(x):
    # PyTorch nn.GELU(approximate='tanh'):
    # 0.5 * x * (1 + tanh(sqrt(2/pi) * (x + 0.044715 * x^3)))
    return 0.5 * x * (1.0 + jnp.tanh(_SQRT_2_OVER_PI * (x + 0.044715 * x * x * x)))


def _round_up(x, m):
    return (x + m - 1) // m * m


# --------------------------------------------------------------------------
# Kernels
# --------------------------------------------------------------------------

def _mlp_kernel_resident(x_ref, wfc_ref, bfc_ref, wproj_ref, bproj_ref, o_ref):
    # x_ref:     (tm, n_embd)
    # wfc_ref:   (hidden, n_embd)  -- c_fc.weight, native (out, in) layout
    # bfc_ref:   (1, hidden)  f32
    # wproj_ref: (hidden, n_embd)  -- c_proj.weight.T, (in, out) layout
    # bproj_ref: (1, n_embd)  f32
    # o_ref:     (tm, n_embd)
    h = lax.dot_general(
        x_ref[...], wfc_ref[...],
        dimension_numbers=(((1,), (1,)), ((), ())),   # x @ W_fc.T  (MXU, f32 acc)
        preferred_element_type=jnp.float32)
    g = _gelu_tanh(h + bfc_ref[...])                  # f32 GELU (VPU poly + EUP tanh)
    y = jnp.dot(g.astype(wproj_ref.dtype), wproj_ref[...],
                preferred_element_type=jnp.float32)
    o_ref[...] = (y + bproj_ref[...]).astype(o_ref.dtype)


def _mlp_kernel_tiled(x_ref, wfc_ref, bfc_ref, wproj_ref, bproj_ref, o_ref,
                      acc_ref):
    # Same layouts as above but W_fc / W_proj are contiguous (tk_h, n_embd)
    # row-strips of the hidden axis; acc_ref is a (tm, n_embd) f32 accumulator.
    k = pl.program_id(1)

    @pl.when(k == 0)
    def _():
        acc_ref[...] = jnp.zeros_like(acc_ref)

    h = lax.dot_general(
        x_ref[...], wfc_ref[...],
        dimension_numbers=(((1,), (1,)), ((), ())),
        preferred_element_type=jnp.float32)
    g = _gelu_tanh(h + bfc_ref[...])
    acc_ref[...] += jnp.dot(g.astype(wproj_ref.dtype), wproj_ref[...],
                            preferred_element_type=jnp.float32)

    @pl.when(k == pl.num_programs(1) - 1)
    def _():
        o_ref[...] = (acc_ref[...] + bproj_ref[...]).astype(o_ref.dtype)


# --------------------------------------------------------------------------
# Wrapper
# --------------------------------------------------------------------------

def mlp_forward(x, c_fc_weight, c_fc_bias, c_proj_weight, c_proj_bias, *,
                tm=512, tk_h=1024,
                vmem_budget_bytes=48 * 1024 * 1024,
                vmem_limit_bytes=64 * 1024 * 1024,
                force_tiled=False):
    """GPT-2 MLP: c_proj(gelu_tanh(c_fc(x))).

    Weight layouts are PyTorch nn.Linear native (out_features, in_features):
      c_fc_weight:   (4*n_embd, n_embd)     c_fc_bias:   (4*n_embd,)
      c_proj_weight: (n_embd, 4*n_embd)     c_proj_bias: (n_embd,)
    x: (B, T, n_embd) -> (B, T, n_embd). bf16 weights/activations are used in
    their native dtype on the MXU; accumulation is always f32.
    """
    B, T, n_embd = x.shape
    hidden = c_fc_weight.shape[0]
    M = B * T

    # Both weights presented to the kernel as (hidden, n_embd): c_fc as-is
    # (contiguous row strips along hidden), c_proj transposed once host-side.
    w_fc = c_fc_weight
    w_proj = c_proj_weight.T

    xsz = x.dtype.itemsize
    wsz = w_fc.dtype.itemsize

    # ---- Row tile: large by default, but shrink for small M (decode). ------
    if M <= tm:
        tm_eff = _round_up(max(M, 1), 8)
    else:
        tm_eff = _round_up(tm, 8)
    m_pad = _round_up(M, tm_eff)

    # ---- VMEM usage estimates (count 2x for double-buffered operands). -----
    def _resident_bytes(tm_):
        w = 2 * hidden * n_embd * wsz * 2            # W_fc + W_proj (x2 buffers)
        io = 2 * tm_ * n_embd * xsz * 2              # x + out tiles, double-buffered
        tmp = 2 * tm_ * hidden * 4                   # f32 h / gelu temporaries
        bias = 2 * (hidden + n_embd) * 4
        return w + io + tmp + bias

    def _tiled_bytes(tm_, tk_):
        w = 2 * 2 * tk_ * n_embd * wsz               # W_fc + W_proj slices, x2 buffers
        io = 2 * tm_ * n_embd * xsz * 2
        acc = tm_ * n_embd * 4
        tmp = 2 * tm_ * tk_ * 4
        bias = 2 * (hidden + n_embd) * 4
        return w + io + acc + tmp + bias

    use_resident = (not force_tiled) and _resident_bytes(tm_eff) <= vmem_budget_bytes

    if not use_resident:
        # Hidden tile: prefer big multiples of 256 (matches 2x256^2 MXU tiles),
        # shrink until the tiled estimate fits the budget.
        candidates = sorted(
            {c for c in (tk_h, 2048, 1024, 768, 512, 384, 256, 128)
             if 0 < c <= hidden and hidden % c == 0},
            reverse=True) or [hidden]
        tk = candidates[-1]
        for c in candidates:
            if _tiled_bytes(tm_eff, c) <= vmem_budget_bytes:
                tk = c
                break
        # If still over budget, halve the row tile.
        while _tiled_bytes(tm_eff, tk) > vmem_budget_bytes and tm_eff > 128:
            tm_eff = max(128, tm_eff // 2)
            m_pad = _round_up(M, tm_eff)

    # ---- Host-side prep: flatten rows, pad, pre-cast biases to f32. --------
    x2 = x.reshape(M, n_embd)
    if m_pad != M:
        x2 = jnp.pad(x2, ((0, m_pad - M), (0, 0)))
    bfc2 = c_fc_bias.reshape(1, hidden).astype(jnp.float32)
    bproj2 = c_proj_bias.reshape(1, n_embd).astype(jnp.float32)

    cost = pl.CostEstimate(
        flops=int(4 * M * n_embd * hidden),
        transcendentals=int(M * hidden),
        bytes_accessed=int(2 * M * n_embd * xsz
                           + 2 * hidden * n_embd * wsz
                           + (hidden + n_embd) * 4),
    )

    if use_resident:
        grid = (m_pad // tm_eff,)
        out = pl.pallas_call(
            _mlp_kernel_resident,
            out_shape=jax.ShapeDtypeStruct((m_pad, n_embd), x.dtype),
            grid_spec=pltpu.PrefetchScalarGridSpec(
                num_scalar_prefetch=0,
                grid=grid,
                in_specs=[
                    pl.BlockSpec((tm_eff, n_embd), lambda i: (i, 0)),    # x rows
                    pl.BlockSpec((hidden, n_embd), lambda i: (0, 0)),    # W_fc (resident)
                    pl.BlockSpec((1, hidden), lambda i: (0, 0)),         # b_fc
                    pl.BlockSpec((hidden, n_embd), lambda i: (0, 0)),    # W_proj (resident)
                    pl.BlockSpec((1, n_embd), lambda i: (0, 0)),         # b_proj
                ],
                out_specs=pl.BlockSpec((tm_eff, n_embd), lambda i: (i, 0)),
            ),
            compiler_params=pltpu.CompilerParams(
                dimension_semantics=("parallel",),
                vmem_limit_bytes=vmem_limit_bytes),
            cost_estimate=cost,
        )(x2, w_fc, bfc2, w_proj, bproj2)
    else:
        grid = (m_pad // tm_eff, hidden // tk)
        out = pl.pallas_call(
            _mlp_kernel_tiled,
            out_shape=jax.ShapeDtypeStruct((m_pad, n_embd), x.dtype),
            grid_spec=pltpu.PrefetchScalarGridSpec(
                num_scalar_prefetch=0,
                grid=grid,
                in_specs=[
                    pl.BlockSpec((tm_eff, n_embd), lambda i, k: (i, 0)),  # x rows
                    pl.BlockSpec((tk, n_embd), lambda i, k: (k, 0)),      # W_fc row strip
                    pl.BlockSpec((1, tk), lambda i, k: (0, k)),           # b_fc slice
                    pl.BlockSpec((tk, n_embd), lambda i, k: (k, 0)),      # W_proj row strip
                    pl.BlockSpec((1, n_embd), lambda i, k: (0, 0)),       # b_proj
                ],
                out_specs=pl.BlockSpec((tm_eff, n_embd), lambda i, k: (i, 0)),
                scratch_shapes=[pltpu.VMEM((tm_eff, n_embd), jnp.float32)],
            ),
            compiler_params=pltpu.CompilerParams(
                dimension_semantics=("parallel", "arbitrary"),
                vmem_limit_bytes=vmem_limit_bytes),
            cost_estimate=cost,
        )(x2, w_fc, bfc2, w_proj, bproj2)

    if m_pad != M:
        out = out[:M]
    return out.reshape(B, T, n_embd)


# --------------------------------------------------------------------------
# Pure-JAX reference (PyTorch-layout weights)
# --------------------------------------------------------------------------

def mlp_reference(x, c_fc_weight, c_fc_bias, c_proj_weight, c_proj_bias):
    h = jnp.einsum("btd,hd->bth", x, c_fc_weight) + c_fc_bias
    g = _gelu_tanh(h)
    return jnp.einsum("bth,dh->btd", g, c_proj_weight) + c_proj_bias


if __name__ == "__main__":
    def make_inputs(key, B, T, n_embd, dtype=jnp.float32):
        hidden = 4 * n_embd
        kx, kw1, kb1, kw2, kb2 = jax.random.split(key, 5)
        x = jax.random.normal(kx, (B, T, n_embd), dtype=dtype)
        c_fc_w = jax.random.normal(kw1, (hidden, n_embd), dtype=dtype) * 0.02
        c_fc_b = jax.random.normal(kb1, (hidden,), dtype=dtype) * 0.02
        c_proj_w = jax.random.normal(kw2, (n_embd, hidden), dtype=dtype) * 0.02
        c_proj_b = jax.random.normal(kb2, (n_embd,), dtype=dtype) * 0.02
        return x, c_fc_w, c_fc_b, c_proj_w, c_proj_b

    # Path 1: resident-weights kernel (small width -> weights live in VMEM).
    args = make_inputs(jax.random.PRNGKey(0), 2, 8, 32)
    out = jax.block_until_ready(mlp_forward(*args))
    ref = mlp_reference(*args)
    assert out.shape == ref.shape
    assert jnp.allclose(out, ref, atol=1e-5, rtol=1e-5), "resident path mismatch"

    # Path 2: hidden-tiled kernel (forced; exercises k-axis accumulation).
    args2 = make_inputs(jax.random.PRNGKey(1), 2, 8, 64)
    out2 = jax.block_until_ready(mlp_forward(*args2, force_tiled=True, tk_h=128))
    ref2 = mlp_reference(*args2)
    assert out2.shape == ref2.shape
    assert jnp.allclose(out2, ref2, atol=1e-5, rtol=1e-5), "tiled path mismatch"

    print("KERNEL_OK")
</pallas_src>

<mosaic_0001>
module attributes {stable_mosaic.version = 11 : i64} {
  func.func @_mlp_kernel_resident(%arg0: i32, %arg1: memref<16x32xf32, #tpu.memory_space<vmem>>, %arg2: memref<128x32xf32, #tpu.memory_space<vmem>>, %arg3: memref<1x128xf32, #tpu.memory_space<vmem>>, %arg4: memref<128x32xf32, #tpu.memory_space<vmem>>, %arg5: memref<1x32xf32, #tpu.memory_space<vmem>>, %arg6: memref<16x32xf32, #tpu.memory_space<vmem>>) attributes {dimension_semantics = [#tpu.dimension_semantics<parallel>], iteration_bounds = array<i64: 1>, scalar_prefetch = 0 : i64, scratch_operands = 0 : i64, tpu.core_type = #tpu.core_type<tc>, window_params = [{transform_indices = @transform_0, window_bounds = array<i64: 16, 32>}, {pipeline_mode = #tpu.pipeline_mode<synchronous>, transform_indices = @transform_1, window_bounds = array<i64: 128, 32>}, {pipeline_mode = #tpu.pipeline_mode<synchronous>, transform_indices = @transform_2, window_bounds = array<i64: 1, 128>}, {pipeline_mode = #tpu.pipeline_mode<synchronous>, transform_indices = @transform_3, window_bounds = array<i64: 128, 32>}, {pipeline_mode = #tpu.pipeline_mode<synchronous>, transform_indices = @transform_4, window_bounds = array<i64: 1, 32>}, {transform_indices = @transform_5, window_bounds = array<i64: 16, 32>}]} {
    %c0 = arith.constant 0 : index
    %c0_0 = arith.constant 0 : index
    %0 = vector.load %arg1[%c0, %c0_0] : memref<16x32xf32, #tpu.memory_space<vmem>>, vector<16x32xf32>
    %c0_1 = arith.constant 0 : index
    %c0_2 = arith.constant 0 : index
    %1 = vector.load %arg2[%c0_1, %c0_2] : memref<128x32xf32, #tpu.memory_space<vmem>>, vector<128x32xf32>
    %cst = arith.constant dense<0.000000e+00> : vector<16x128xf32>
    %2 = tpu.matmul %0, %1, %cst {dimension_numbers = #tpu.dot_dimension_numbers<[1], [1], [0], [0], [0, 0, 1, 0], [], []>} : vector<16x32xf32>, vector<128x32xf32>, vector<16x128xf32> -> vector<16x128xf32>
    %c0_3 = arith.constant 0 : index
    %c0_4 = arith.constant 0 : index
    %3 = vector.load %arg3[%c0_3, %c0_4] : memref<1x128xf32, #tpu.memory_space<vmem>>, vector<1x128xf32>
    %4 = vector.broadcast %3 : vector<1x128xf32> to vector<16x128xf32>
    %5 = arith.addf %2, %4 : vector<16x128xf32>
    %cst_5 = arith.constant 5.000000e-01 : f32
    %6 = vector.broadcast %cst_5 : f32 to vector<16x128xf32>
    %7 = arith.mulf %6, %5 : vector<16x128xf32>
    %cst_6 = arith.constant 4.471500e-02 : f32
    %8 = vector.broadcast %cst_6 : f32 to vector<16x128xf32>
    %9 = arith.mulf %8, %5 : vector<16x128xf32>
    %10 = arith.mulf %9, %5 : vector<16x128xf32>
    %11 = arith.mulf %10, %5 : vector<16x128xf32>
    %12 = arith.addf %5, %11 : vector<16x128xf32>
    %cst_7 = arith.constant 0.797884583 : f32
    %13 = vector.broadcast %cst_7 : f32 to vector<16x128xf32>
    %14 = arith.mulf %13, %12 : vector<16x128xf32>
    %15 = math.tanh %14 : vector<16x128xf32>
    %cst_8 = arith.constant 1.000000e+00 : f32
    %16 = vector.broadcast %cst_8 : f32 to vector<16x128xf32>
    %17 = arith.addf %16, %15 : vector<16x128xf32>
    %18 = arith.mulf %7, %17 : vector<16x128xf32>
    %c0_9 = arith.constant 0 : index
    %c0_10 = arith.constant 0 : index
    %19 = vector.load %arg4[%c0_9, %c0_10] : memref<128x32xf32, #tpu.memory_space<vmem>>, vector<128x32xf32>
    %cst_11 = arith.constant dense<0.000000e+00> : vector<16x32xf32>
    %20 = tpu.matmul %18, %19, %cst_11 {dimension_numbers = #tpu.dot_dimension_numbers<[1], [0], [0], [1], [0, 0, 1, 1], [], []>} : vector<16x128xf32>, vector<128x32xf32>, vector<16x32xf32> -> vector<16x32xf32>
    %c0_12 = arith.constant 0 : index
    %c0_13 = arith.constant 0 : index
    %21 = vector.load %arg5[%c0_12, %c0_13] : memref<1x32xf32, #tpu.memory_space<vmem>>, vector<1x32xf32>
    %22 = vector.broadcast %21 : vector<1x32xf32> to vector<16x32xf32>
    %23 = arith.addf %20, %22 : vector<16x32xf32>
    %c0_14 = arith.constant 0 : index
    %c0_15 = arith.constant 0 : index
    %24 = vector.load %arg6[%c0_14, %c0_15] : memref<16x32xf32, #tpu.memory_space<vmem>>, vector<16x32xf32>
    tpu.vector_store %arg6[%c0_14, %c0_15], %23 {strides = array<i32>} : memref<16x32xf32, #tpu.memory_space<vmem>>, vector<16x32xf32>,
    return
  }
  func.func @transform_0(%arg0: i32) -> (i32, i32) {
    %c0_i32 = arith.constant 0 : i32
    %c0_i32_0 = arith.constant 0 : i32
    return %arg0, %c0_i32 : i32, i32
  }
  func.func @transform_1(%arg0: i32) -> (i32, i32) {
    %c0_i32 = arith.constant 0 : i32
    %c0_i32_0 = arith.constant 0 : i32
    %c0_i32_1 = arith.constant 0 : i32
    return %c0_i32, %c0_i32_0 : i32, i32
  }
  func.func @transform_2(%arg0: i32) -> (i32, i32) {
    %c0_i32 = arith.constant 0 : i32
    %c0_i32_0 = arith.constant 0 : i32
    %c0_i32_1 = arith.constant 0 : i32
    return %c0_i32, %c0_i32_0 : i32, i32
  }
  func.func @transform_3(%arg0: i32) -> (i32, i32) {
    %c0_i32 = arith.constant 0 : i32
    %c0_i32_0 = arith.constant 0 : i32
    %c0_i32_1 = arith.constant 0 : i32
    return %c0_i32, %c0_i32_0 : i32, i32
  }
  func.func @transform_4(%arg0: i32) -> (i32, i32) {
    %c0_i32 = arith.constant 0 : i32
    %c0_i32_0 = arith.constant 0 : i32
    %c0_i32_1 = arith.constant 0 : i32
    return %c0_i32, %c0_i32_0 : i32, i32
  }
  func.func @transform_5(%arg0: i32) -> (i32, i32) {
    %c0_i32 = arith.constant 0 : i32
    %c0_i32_0 = arith.constant 0 : i32
    return %arg0, %c0_i32 : i32, i32
  }
}

</mosaic_0001>

<bundles_post_ra>
// kernel: tpu_custom_call.1
= control target key start
LH: loop header
LB: loop body
LE: loop exit
PB: predicated region body
PF: predicated region fallthrough
CT: control target
= control target key end

     0   :  { %10 = vsyncpa [#allocation3], 0  ;;  %s906_s0 = inlined_call_operand.hbm [shape: f32[16,32], index: 0, kind: input, shape index: {}]   ;;  %s907_s1 = inlined_call_operand.hbm [shape: f32[128,32], index: 1, kind: input, shape index: {}]   ;;  %s908_s2 = inlined_call_operand.hbm [shape: f32[1,128], index: 2, kind: input, shape index: {}]   ;;  %s909_s3 = inlined_call_operand.hbm [shape: f32[128,32], index: 3, kind: input, shape index: {}]   ;;  %s910_s4 = inlined_call_operand.hbm [shape: f32[1,32], index: 4, kind: input, shape index: {}]   ;;  %s911_s5 = inlined_call_operand.hbm [shape: f32[16,32], index: 5, kind: output, shape index: {}]  }
   0x1   :  { %11 = vsyncpa [#allocation6], 0 }
   0x2   :  { %12 = vsyncpa [#allocation9], 0 }
   0x3   :  { %13 = vsyncpa [#allocation4], 0  ;;  %s735_s18 = smov [#allocation5]   ;;  %s736_s20 = smov [#allocation8]  }
   0x4   :  { %s31_s19 = sshll.u32 %s735_s18, 4  ;;  %s53_s21 = sshll.u32 %s736_s20, 4  ;;  %s32_s19 = int_to_ptr.vmem [resolvable:$true] %s31_s19  ;;  %s773_s21 = int_to_ptr.vmem [resolvable:$true] %s53_s21 }
   0x5   :  { %s595_s24 = scalar_lea.hbm %s907_s1, 2048 }
   0x6   :  { %p596_p0 = scmp.ne.s32.totalorder %s907_s1, %s595_s24  ;;  %p599_p1 = scmp.lt.u32.totalorder %s595_s24, %s907_s1 }
   0x8   :  { %p601_p2 = pnand %p599_p1, %p596_p0 }
   0xa   :  { %604 = shalt.err (!%p601_p2)
}
   0xb   :  { %s605_s29 = scalar_lea.vmem %s32_s19, 2048  ;;  %p610_p4 = scmp.lt.s32.totalorder %s32_s19, %s32_s19 }
   0xc   :  { %p606_p3 = scmp.ne.s32.totalorder %s32_s19, %s605_s29  ;;  %p611_p5 = scmp.lt.s32.totalorder %s605_s29, %s605_s29 }
   0xe   :  { %p612_p6 = por %p611_p5, %p610_p4 }
  0x10   :  { %p613_p7 = pnand %p612_p6, %p606_p3 }
  0x12   :  { %616 = shalt.err (!%p613_p7)
}
  0x13   :  { %s737_s30 = smov 128   ;;  %s738_s6 = smov 8  }
  0x14   :  { %37 = dma.hbm_to_vmem [thread:$0]  %s907_s1, 2048, %s32_s19, [#allocation6], %s737_s30, %s737_s30, %s738_s6  }
  0x15   :  { %s617_s11 = scalar_lea.hbm %s909_s3, 2048 }
  0x16   :  { %p618_p8 = scmp.ne.s32.totalorder %s909_s3, %s617_s11  ;;  %p621_p9 = scmp.lt.u32.totalorder %s617_s11, %s909_s3 }
  0x18   :  { %p623_p10 = pnand %p621_p9, %p618_p8 }
  0x1a   :  { %626 = shalt.err (!%p623_p10)
}
  0x1b   :  { %s627_s16 = scalar_lea.vmem %s773_s21, 2048  ;;  %p632_p12 = scmp.lt.s32.totalorder %s773_s21, %s773_s21 }
  0x1c   :  { %p628_p11 = scmp.ne.s32.totalorder %s773_s21, %s627_s16  ;;  %p633_p13 = scmp.lt.s32.totalorder %s627_s16, %s627_s16 }
  0x1e   :  { %p634_p0 = por %p633_p13, %p632_p12 }
  0x20   :  { %p635_p1 = pnand %p634_p0, %p628_p11 }
  0x22   :  { %638 = shalt.err (!%p635_p1)
}
  0x23   :  { %59 = dma.hbm_to_vmem [thread:$0]  %s909_s3, 2048, %s773_s21, [#allocation9], %s737_s30, %s737_s30, %s738_s6  }
  0x24   :  { %s739_s18 = smov [#allocation2]   ;;  %s740_s20 = smov [#allocation7]  }
  0x25   :  { %s19_s19 = sshll.u32 %s739_s18, 4  ;;  %s44_s22 = sshll.u32 %s740_s20, 4  ;;  %s20_s19 = int_to_ptr.vmem [resolvable:$true] %s19_s19  ;;  %s45_s22 = int_to_ptr.vmem [resolvable:$true] %s44_s22 }
  0x26   :  { %s639_s25 = scalar_lea.hbm %s906_s0, 256 }
  0x27   :  { %p640_p2 = scmp.ne.s32.totalorder %s906_s0, %s639_s25  ;;  %p643_p3 = scmp.lt.u32.totalorder %s639_s25, %s906_s0 }
  0x29   :  { %p645_p4 = pnand %p643_p3, %p640_p2 }
  0x2b   :  { %648 = shalt.err (!%p645_p4)
}
  0x2c   :  { %s649_s3 = scalar_lea.vmem %s20_s19, 256  ;;  %p654_p6 = scmp.lt.s32.totalorder %s20_s19, %s20_s19 }
  0x2d   :  { %p650_p5 = scmp.ne.s32.totalorder %s20_s19, %s649_s3  ;;  %p655_p7 = scmp.lt.s32.totalorder %s649_s3, %s649_s3 }
  0x2f   :  { %p656_p8 = por %p655_p7, %p654_p6 }
  0x31   :  { %p657_p9 = pnand %p656_p8, %p650_p5 }
  0x33   :  { %660 = shalt.err (!%p657_p9)
}
  0x34   :  { %25 = dma.hbm_to_vmem [thread:$0]  %s906_s0, 256, %s20_s19, [#allocation3], %s737_s30, %s737_s30, %s738_s6  }
  0x35   :  { %s661_s10 = scalar_lea.hbm %s908_s2, 16 }
  0x36   :  { %p662_p10 = scmp.ne.s32.totalorder %s908_s2, %s661_s10  ;;  %p665_p11 = scmp.lt.u32.totalorder %s661_s10, %s908_s2 }
  0x38   :  { %p667_p12 = pnand %p665_p11, %p662_p10 }
  0x3a   :  { %670 = shalt.err (!%p667_p12)
}
  0x3b   :  { %s671_s15 = scalar_lea.vmem %s45_s22, 16  ;;  %s675_s16 = scalar_lea.vmem %s45_s22, 32 }
  0x3c   :  { %p672_p13 = scmp.ne.s32.totalorder %s45_s22, %s671_s15  ;;  %p676_p0 = scmp.lt.s32.totalorder %s45_s22, %s45_s22 }
  0x3d   :  { %p677_p1 = scmp.lt.s32.totalorder %s675_s16, %s671_s15 }
  0x3f   :  { %p678_p2 = por %p677_p1, %p676_p0 }
  0x41   :  { %p679_p3 = pnand %p678_p2, %p672_p13 }
  0x43   :  { %682 = shalt.err (!%p679_p3)
}
  0x44   :  { %47 = dma.hbm_to_vmem [thread:$0]  %s908_s2, 16, %s45_s22, [#allocation6]  }
  0x45   :  { %s741_s17 = smov [#allocation10]   ;;  %s683_s23 = scalar_lea.hbm %s910_s4, 16 }
  0x46   :  { %s66_s18 = sshll.u32 %s741_s17, 4  ;;  %p684_p4 = scmp.ne.s32.totalorder %s910_s4, %s683_s23  ;;  %s67_s18 = int_to_ptr.vmem [resolvable:$true] %s66_s18 }
  0x47   :  { %p687_p5 = scmp.lt.u32.totalorder %s683_s23, %s910_s4 }
  0x49   :  { %p689_p6 = pnand %p687_p5, %p684_p4 }
  0x4b   :  { %692 = shalt.err (!%p689_p6)
}
  0x4c   :  { %s693_s28 = scalar_lea.vmem %s67_s18, 16  ;;  %s697_s2 = scalar_lea.vmem %s67_s18, 32 }
  0x4d   :  { %p694_p7 = scmp.ne.s32.totalorder %s67_s18, %s693_s28  ;;  %p698_p8 = scmp.lt.s32.totalorder %s67_s18, %s67_s18 }
  0x4e   :  { %p699_p9 = scmp.lt.s32.totalorder %s697_s2, %s693_s28 }
  0x50   :  { %p700_p10 = por %p699_p9, %p698_p8 }
  0x52   :  { %p701_p11 = pnand %p700_p10, %p694_p7 }
  0x54   :  { %704 = shalt.err (!%p701_p11)
}
  0x55   :  { %69 = dma.hbm_to_vmem [thread:$0]  %s910_s4, 16, %s67_s18, [#allocation9]  }
  0x56   :  { %727 = dma.done.wait [#allocation3], 256  }
  0x57   :  { %728 = vsyncadd [#allocation3], 4294967040 }
  0x58   :  { %729 = dma.done.wait [#allocation6], 2064  }
  0x59   :  { %730 = vsyncadd [#allocation6], 4294965232 }
  0x5a   :  { %731 = dma.done.wait [#allocation9], 2064  }
  0x5b   :  { %732 = vsyncadd [#allocation9], 4294965232  ;;  %vm110_vm0 = vcmask 261120   ;;  %v87_v1 = vld [vmem:[#allocation5] sm:$0xff]  ;;  %v88_v2 = vld [vmem:[#allocation5 + $0x8] sm:$0xff]  ;;  %s742_s4 = smov [#allocation11]  }
  0x5c   :  { %vm851_vm1 = vmpackc.low %vm110_vm0, %vm110_vm0  ;;  %v89_v3 = vld [vmem:[#allocation5 + $0x10] sm:$0xff]  ;;  %v503_v4 = vpack.c.bf16 %v88_v2, %v87_v1  ;;  %v90_v5 = vld [vmem:[#allocation5 + $0x18] sm:$0xff]  ;;  %s363_s3 = sshll.u32 %s742_s4, 4  ;;  %s364_s3 = int_to_ptr.vmem [resolvable:$true] %s363_s3 }
  0x5d   :  { %v509_v6 = vpack.c.bf16 %v90_v5, %v89_v3  ;;  %v91_v7 = vld [vmem:[#allocation5 + $0x20] sm:$0xff]  ;;  %v85_v8 = vld [vmem:[#allocation2] sm:$0xff]  ;;  %v92_v9 = vld [vmem:[#allocation5 + $0x28] sm:$0xff]  ;;  %s705_s21 = scalar_lea.vmem %s364_s3, 256  ;;  %p710_p13 = scmp.lt.s32.totalorder %s364_s3, %s364_s3 }
  0x5e   :  { %505 = vmatprep.subr.msk.bf16.mxu0 %vm851_vm1, %v503_v4  ;;  %465 = vmatprep.mubr.msk.f32.mxu0 %vm110_vm0, %v85_v8  ;;  %v258_v10 = vld [vmem:[#allocation8] sm:$0xff]  ;;  %v259_v11 = vld [vmem:[#allocation8 + $0x8] sm:$0xff]  ;;  %v515_v13 = vpack.c.bf16 %v92_v9, %v91_v7  ;;  %v94_v15 = vld [vmem:[#allocation5 + $0x38] sm:$0xff]  ;;  %p706_p12 = scmp.ne.s32.totalorder %s364_s3, %s705_s21  ;;  %p711_p0 = scmp.lt.s32.totalorder %s705_s21, %s705_s21 }
  0x5f   :  { %508 = vmatpush3.bf16.xpose.msk.msra.mxu0 %vm851_vm1, %v503_v4  ;;  %v551_v12 = vpack.c.bf16 %v259_v11, %v258_v10  ;;  %v93_v14 = vld [vmem:[#allocation5 + $0x30] sm:$0xff]  ;;  %v95_v17 = vld [vmem:[#allocation5 + $0x40] sm:$0xff]  ;;  %v96_v18 = vld [vmem:[#allocation5 + $0x48] sm:$0xff] }
  0x60   :  { %511 = vmatprep.subr.msk.bf16.mxu0 %vm851_vm1, %v509_v6  ;;  %v521_v16 = vpack.c.bf16 %v94_v15, %v93_v14  ;;  %v527_v19 = vpack.c.bf16 %v96_v18, %v95_v17  ;;  %v97_v20 = vld [vmem:[#allocation5 + $0x50] sm:$0xff]  ;;  %v98_v21 = vld [vmem:[#allocation5 + $0x58] sm:$0xff]  ;;  %v99_v23 = vld [vmem:[#allocation5 + $0x60] sm:$0xff]  ;;  %p712_p1 = por %p711_p0, %p710_p13 }
  0x61   :  { %552 = vmatprep.subr.bf16.mxu1 %v551_v12  ;;  %v533_v22 = vpack.c.bf16 %v98_v21, %v97_v20  ;;  %v100_v24 = vld [vmem:[#allocation5 + $0x68] sm:$0xff]  ;;  %v101_v26 = vld [vmem:[#allocation5 + $0x70] sm:$0xff]  ;;  %v102_v27 = vld [vmem:[#allocation5 + $0x78] sm:$0xff] }
  0x62   :  { %554 = vmatpush3.bf16.msra.mxu1 %v551_v12  ;;  %v539_v25 = vpack.c.bf16 %v100_v24, %v99_v23  ;;  %v545_v28 = vpack.c.bf16 %v102_v27, %v101_v26  ;;  %v86_v29 = vld [vmem:[#allocation2 + $0x8] sm:$0xff]  ;;  %v262_v33 = vld [vmem:[#allocation8 + $0x20] sm:$0xff]  ;;  %v263_v34 = vld [vmem:[#allocation8 + $0x28] sm:$0xff]  ;;  %p713_p2 = pnand %p712_p1, %p706_p12 }
  0x63   :  { %v260_v30 = vld [vmem:[#allocation8 + $0x10] sm:$0xff]  ;;  %v261_v31 = vld [vmem:[#allocation8 + $0x18] sm:$0xff]  ;;  %v559_v35 = vpack.c.bf16 %v263_v34, %v262_v33  ;;  %v266_v38 = vld [vmem:[#allocation8 + $0x40] sm:$0xff] }
  0x64   :  { %v555_v32 = vpack.c.bf16 %v261_v31, %v260_v30  ;;  %v264_v36 = vld [vmem:[#allocation8 + $0x30] sm:$0xff]  ;;  %v265_v37 = vld [vmem:[#allocation8 + $0x38] sm:$0xff]  ;;  %v267_v40 = vld [vmem:[#allocation8 + $0x48] sm:$0xff] }
  0x65   :  { %v563_v39 = vpack.c.bf16 %v265_v37, %v264_v36  ;;  %v567_v41 = vpack.c.bf16 %v267_v40, %v266_v38  ;;  %v268_v42 = vld [vmem:[#allocation8 + $0x50] sm:$0xff]  ;;  %v269_v43 = vld [vmem:[#allocation8 + $0x58] sm:$0xff]  ;;  %v270_v45 = vld [vmem:[#allocation8 + $0x60] sm:$0xff] }
  0x66   :  { %556 = vmatprep.subr.bf16.mxu1 %v555_v32  ;;  %v571_v44 = vpack.c.bf16 %v269_v43, %v268_v42  ;;  %v271_v46 = vld [vmem:[#allocation8 + $0x68] sm:$0xff]  ;;  %v272_v48 = vld [vmem:[#allocation8 + $0x70] sm:$0xff]  ;;  %v273_v49 = vld [vmem:[#allocation8 + $0x78] sm:$0xff] }
  0x67   :  { %514 = vmatpush3.bf16.xpose.msk.msra.mxu0 %vm851_vm1, %v509_v6  ;;  %558 = vmatpush3.bf16.msra.mxu1 %v555_v32  ;;  %v575_v47 = vpack.c.bf16 %v271_v46, %v270_v45  ;;  %v579_v50 = vpack.c.bf16 %v273_v49, %v272_v48  ;;  %v377_v51 = vld [vmem:[#allocation7] ss:$0 sm:$0xff]  ;;  %v396_v10 = vld [vmem:[#allocation10] ss:$0 sm:$0xff] }
  0x68   :  { %517 = vmatprep.subr.msk.bf16.mxu0 %vm851_vm1, %v515_v13  ;;  %560 = vmatprep.subr.bf16.mxu1 %v559_v35 }
  0x6b   :  { %562 = vmatpush3.bf16.msra.mxu1 %v559_v35 }
  0x6c   :  { %564 = vmatprep.subr.bf16.mxu1 %v563_v39 }
  0x6f   :  { %520 = vmatpush3.bf16.xpose.msk.msra.mxu0 %vm851_vm1, %v515_v13  ;;  %566 = vmatpush3.bf16.msra.mxu1 %v563_v39 }
  0x70   :  { %523 = vmatprep.subr.msk.bf16.mxu0 %vm851_vm1, %v521_v16  ;;  %568 = vmatprep.subr.bf16.mxu1 %v567_v41 }
  0x73   :  { %570 = vmatpush3.bf16.msra.mxu1 %v567_v41 }
  0x74   :  { %572 = vmatprep.subr.bf16.mxu1 %v571_v44 }
  0x77   :  { %526 = vmatpush3.bf16.xpose.msk.msra.mxu0 %vm851_vm1, %v521_v16  ;;  %574 = vmatpush3.bf16.msra.mxu1 %v571_v44 }
  0x78   :  { %529 = vmatprep.subr.msk.bf16.mxu0 %vm851_vm1, %v527_v19  ;;  %576 = vmatprep.subr.bf16.mxu1 %v575_v47 }
  0x7b   :  { %578 = vmatpush3.bf16.msra.mxu1 %v575_v47 }
  0x7c   :  { %580 = vmatprep.subr.bf16.mxu1 %v579_v50 }
  0x7f   :  { %532 = vmatpush3.bf16.xpose.msk.msra.mxu0 %vm851_vm1, %v527_v19  ;;  %582 = vmatpush3.bf16.msra.mxu1 %v579_v50 }
  0x80   :  { %535 = vmatprep.subr.msk.bf16.mxu0 %vm851_vm1, %v533_v22 }
  0x87   :  { %538 = vmatpush3.bf16.xpose.msk.msra.mxu0 %vm851_vm1, %v533_v22 }
  0x88   :  { %541 = vmatprep.subr.msk.bf16.mxu0 %vm851_vm1, %v539_v25 }
  0x8f   :  { %544 = vmatpush3.bf16.xpose.msk.msra.mxu0 %vm851_vm1, %v539_v25 }
  0x90   :  { %547 = vmatprep.subr.msk.bf16.mxu0 %vm851_vm1, %v545_v28 }
  0x97   :  { %550 = vmatpush3.bf16.xpose.msk.msra.mxu0 %vm851_vm1, %v545_v28 }
  0x9e   :  { %466 = vmatmul.mubr.msk.f32.vlgmr.msra.gmra.mrb[0].mxu0 %vm110_vm0, %v86_v29 }
 0x171   :  { %v467_v52 = vpop.f32.mrb[0].mxu0 }
 0x172   :  { %v237_v53 = vadd.f32 %v467_v52, %v377_v51  ;;  %v231_v54 = vpop.f32.mrb[1].mxu0 }
 0x173   :  { %v232_v55 = vadd.f32 %v377_v51, %v231_v54 }
 0x174   :  { %v243_v56 = vmul.f32 0.044715, %v237_v53  ;;  %v241_v7 = vmul.f32 0.5, %v237_v53 }
 0x175   :  { %v242_v57 = vmul.f32 0.044715, %v232_v55  ;;  %v240_v5 = vmul.f32 0.5, %v232_v55 }
 0x176   :  { %v245_v58 = vmul.f32 %v243_v56, %v237_v53 }
 0x177   :  { %v244_v59 = vmul.f32 %v242_v57, %v232_v55 }
 0x178   :  { %v247_v60 = vmul.f32 %v245_v58, %v237_v53 }
 0x179   :  { %v246_v61 = vmul.f32 %v244_v59, %v232_v55 }
 0x17a   :  { %v249_v62 = vadd.f32 %v247_v60, %v237_v53 }
 0x17b   :  { %v248_v63 = vadd.f32 %v246_v61, %v232_v55 }
 0x17c   :  { %v251_v0 = vmul.f32 0.7978846, %v249_v62 }
 0x17d   :  { %v250_v1 = vmul.f32 0.7978846, %v248_v63 }
 0x17e   :  { %591 = vtanh.f32 %v251_v0 }
 0x17f   :  { %593 = vtanh.f32 %v250_v1 }
 0x188   :  { %v592_v2 = vpop.eup %591 }
 0x189   :  { %v594_v3 = vpop.eup %593  ;;  %v255_v4 = vadd.f32 1.0, %v592_v2 }
 0x18a   :  { %v254_v6 = vadd.f32 1.0, %v594_v3 }
 0x18b   :  { %v257_v9 = vmul.f32 %v255_v4, %v241_v7 }
 0x18c   :  { %v256_v8 = vmul.f32 %v254_v6, %v240_v5 }
 0x18e   :  { %500 = vmatprep.mubr.f32.mxu1 %v256_v8 }
 0x18f   :  { %501 = vmatmul.mubr.f32.vlgmr.msra.gmra.mrb[0].mxu1 %v257_v9 }
 0x262   :  { %v502_v11 = vpop.f32.mrb[0].mxu1 }
 0x263   :  { %v353_v12 = vadd.f32 %v502_v11, %v396_v10  ;;  %v347_v13 = vpop.f32.mrb[1].mxu1 }
 0x264   :  { %v348_v14 = vadd.f32 %v396_v10, %v347_v13 }
 0x265   :  { %357 = vst.msk [vmem:[#allocation11 + $0x8] sm:$0xff] %vm110_vm0, %v353_v12 }
 0x266   :  { %356 = vst.msk [vmem:[#allocation11] sm:$0xff] %vm110_vm0, %v348_v14 }
 0x267   :  { %716 = shalt.err (!%p713_p2)
}
 0x268   :  { %s717_s9 = scalar_lea.hbm %s911_s5, 256 }
 0x269   :  { %p718_p3 = scmp.ne.s32.totalorder %s911_s5, %s717_s9  ;;  %p721_p4 = scmp.lt.u32.totalorder %s717_s9, %s911_s5 }
 0x26b   :  { %p723_p5 = pnand %p721_p4, %p718_p3 }
 0x26d   :  { %726 = shalt.err (!%p723_p5)
}
 0x26e   :  { %369 = dma.vmem_to_hbm [thread:$0]  %s364_s3, 256, %s911_s5, [#allocation4], %s737_s30, %s737_s30, %s738_s6  }
 0x26f   :  { %733 = dma.done.wait [#allocation4], 256  }
 0x270   :  { %734 = vsyncadd [#allocation4], 4294967040 }
 0x271   :  { %373 = vsyncpa [#allocation3], 1 }
 0x272   :  { %374 = vsyncpa [#allocation6], 1 }
 0x273   :  { %375 = vsyncpa [#allocation9], 1 }
 0x274   :  { %376 = vsyncpa [#allocation4], 1 }

</bundles_post_ra>
